<compile_context>
chip_gen: v7x
topology: tpu7x:2x2x1
jax: 0.10.0
libtpu: 0.0.40
codegen_flags: <defaults>
</compile_context>

<pallas_src>
import math

import jax
import jax.numpy as jnp
from jax.experimental import pallas as pl
from jax.experimental.pallas import tpu as pltpu


def _pe_add_kernel(x_ref, pe_ref, o_ref):
    # x_ref: (TB, TN) block, pe_ref: (1, TN) block -> broadcast over rows.
    # Eval-mode forward: x + pe (nn.Dropout is identity in eval mode).
    o_ref[...] = x_ref[...] + pe_ref[...]


def _pe_add_mask_kernel(x_ref, pe_ref, m_ref, o_ref):
    # Training-mode forward: (x + pe) * mask, where mask is an f32 keep-mask
    # already scaled by 1/(1-p) (inverted dropout). Compute in f32, cast once.
    y = x_ref[...].astype(jnp.float32) + pe_ref[...].astype(jnp.float32)
    o_ref[...] = (y * m_ref[...]).astype(o_ref.dtype)


def _choose_tiles(B, N, itemsize, target_bytes=2 * 1024 * 1024, max_tn=32768):
    """Pick lane-dense, VMEM-friendly block sizes for a (B, N) elementwise op."""
    # Lane tile: full flattened axis if modest, else a large multiple of 128
    # (ragged last block is handled by Pallas).
    if N <= max_tn:
        tn = N                      # equals full dim -> always a legal block dim
    else:
        tn = max_tn                 # multiple of 128 -> legal, unmasked stores
    rows = max(1, target_bytes // max(1, tn * itemsize))
    if rows >= B or B <= 8:
        tb = B                      # equals full dim -> legal
    else:
        tb = max(8, (rows // 8) * 8)  # multiple of 8 -> legal, ~target_bytes block
    return tb, tn


class PositionalEncodingPallas:
    """JAX/Pallas port of the PyTorch PositionalEncoding module."""

    def __init__(self, d_model, dropout, max_len=5000, pe_scale_factor=0.1):
        self.d_model = d_model
        self.dropout_rate = float(dropout)
        self.pe_scale_factor = pe_scale_factor
        # Deterministic buffer construction, identical math to the PyTorch init.
        position = jnp.arange(0, max_len, dtype=jnp.float32)[:, None]      # (max_len, 1)
        div_term = jnp.exp(
            jnp.arange(0, d_model, 2, dtype=jnp.float32)
            * -(math.log(10000.0) / d_model)
        )                                                                   # (d_model/2,)
        angles = position * div_term                                        # (max_len, d/2)
        pe = jnp.zeros((max_len, d_model), dtype=jnp.float32)
        pe = pe.at[:, 0::2].set(jnp.sin(angles) * pe_scale_factor)
        pe = pe.at[:, 1::2].set(jnp.cos(angles) * pe_scale_factor)
        self.pe = pe  # (max_len, d_model)

    def __call__(self, x, *, training=False, rng=None):
        B, L, D = x.shape
        N = L * D

        # Flatten to (B, L*D) so the lane dim is large / 128-aligned; the
        # reshape is free (contiguous) and reversed on the way out.
        x2 = x.reshape(B, N)
        pe_flat = self.pe[:L].astype(x.dtype).reshape(1, N)

        tb, tn = _choose_tiles(B, N, jnp.dtype(x.dtype).itemsize)
        grid = (pl.cdiv(B, tb), pl.cdiv(N, tn))

        x_spec = pl.BlockSpec((tb, tn), lambda b, t: (b, t))
        pe_spec = pl.BlockSpec((1, tn), lambda b, t: (0, t))
        out_spec = pl.BlockSpec((tb, tn), lambda b, t: (b, t))
        cparams = pltpu.CompilerParams(
            dimension_semantics=("parallel", "parallel"))

        if (not training) or self.dropout_rate == 0.0:
            out2 = pl.pallas_call(
                _pe_add_kernel,
                out_shape=jax.ShapeDtypeStruct((B, N), x.dtype),
                grid=grid,
                in_specs=[x_spec, pe_spec],
                out_specs=out_spec,
                compiler_params=cparams,
            )(x2, pe_flat)
            return out2.reshape(B, L, D)

        # Training mode: inverted dropout. The keep-mask (pre-scaled by
        # 1/(1-p), f32) is generated in the wrapper with jax.random so the
        # kernel has no TPU-only PRNG primitives and also runs in interpret
        # mode; the add + mask-multiply stays fused inside the kernel.
        if rng is None:
            rng = jax.random.PRNGKey(0)
        keep = jax.random.bernoulli(rng, 1.0 - self.dropout_rate, (B, N))
        mask = keep.astype(jnp.float32) * (1.0 / (1.0 - self.dropout_rate))

        mask_spec = pl.BlockSpec((tb, tn), lambda b, t: (b, t))
        out2 = pl.pallas_call(
            _pe_add_mask_kernel,
            out_shape=jax.ShapeDtypeStruct((B, N), x.dtype),
            grid=grid,
            in_specs=[x_spec, pe_spec, mask_spec],
            out_specs=out_spec,
            compiler_params=cparams,
        )(x2, pe_flat, mask)
        return out2.reshape(B, L, D)


if __name__ == "__main__":
    # Small shapes consistent with the module: (batch=2, seq=8, d_model=32).
    B, L, D = 2, 8, 32
    key = jax.random.PRNGKey(0)
    x = jax.random.normal(key, (B, L, D), dtype=jnp.float32)

    module = PositionalEncodingPallas(d_model=D, dropout=0.1, max_len=5000,
                                      pe_scale_factor=0.1)

    # Eval-mode forward (deterministic; matches PyTorch eval semantics exactly).
    out = jax.block_until_ready(module(x, training=False))
    ref = x + module.pe[:L][None, :, :]
    assert out.shape == (B, L, D) and out.dtype == x.dtype
    assert jnp.allclose(out, ref, atol=1e-6, rtol=1e-6)

    # Training-mode forward: each element is either dropped (0) or the eval
    # value scaled by 1/(1-p). Deterministic given the rng key (but not
    # bit-identical to torch's RNG stream -- dropout is stochastic by nature).
    rate = module.dropout_rate
    out_tr = jax.block_until_ready(
        module(x, training=True, rng=jax.random.PRNGKey(1)))
    assert out_tr.shape == (B, L, D) and out_tr.dtype == x.dtype
    scaled_ref = ref / (1.0 - rate)
    ok = jnp.isclose(out_tr, 0.0, atol=1e-6) | jnp.isclose(
        out_tr, scaled_ref, atol=1e-5, rtol=1e-5)
    assert bool(jnp.all(ok))

    print("KERNEL_OK")
</pallas_src>

<mosaic_0001>
module attributes {stable_mosaic.version = 11 : i64} {
  func.func @_pe_add_kernel(%arg0: i32, %arg1: i32, %arg2: memref<2x256xf32, #tpu.memory_space<vmem>>, %arg3: memref<1x256xf32, #tpu.memory_space<vmem>>, %arg4: memref<2x256xf32, #tpu.memory_space<vmem>>) attributes {dimension_semantics = [#tpu.dimension_semantics<parallel>, #tpu.dimension_semantics<parallel>], iteration_bounds = array<i64: 1, 1>, scalar_prefetch = 0 : i64, scratch_operands = 0 : i64, tpu.core_type = #tpu.core_type<tc>, window_params = [{transform_indices = @transform_0, window_bounds = array<i64: 2, 256>}, {transform_indices = @transform_1, window_bounds = array<i64: 1, 256>}, {transform_indices = @transform_2, window_bounds = array<i64: 2, 256>}]} {
    %c0 = arith.constant 0 : index
    %c0_0 = arith.constant 0 : index
    %0 = vector.load %arg2[%c0, %c0_0] : memref<2x256xf32, #tpu.memory_space<vmem>>, vector<2x256xf32>
    %c0_1 = arith.constant 0 : index
    %c0_2 = arith.constant 0 : index
    %1 = vector.load %arg3[%c0_1, %c0_2] : memref<1x256xf32, #tpu.memory_space<vmem>>, vector<1x256xf32>
    %2 = vector.broadcast %1 : vector<1x256xf32> to vector<2x256xf32>
    %3 = arith.addf %0, %2 : vector<2x256xf32>
    %c0_3 = arith.constant 0 : index
    %c0_4 = arith.constant 0 : index
    %4 = vector.load %arg4[%c0_3, %c0_4] : memref<2x256xf32, #tpu.memory_space<vmem>>, vector<2x256xf32>
    tpu.vector_store %arg4[%c0_3, %c0_4], %3 {strides = array<i32>} : memref<2x256xf32, #tpu.memory_space<vmem>>, vector<2x256xf32>,
    return
  }
  func.func @transform_0(%arg0: i32, %arg1: i32) -> (i32, i32) {
    %c0_i32 = arith.constant 0 : i32
    return %arg0, %arg1 : i32, i32
  }
  func.func @transform_1(%arg0: i32, %arg1: i32) -> (i32, i32) {
    %c0_i32 = arith.constant 0 : i32
    %c0_i32_0 = arith.constant 0 : i32
    return %c0_i32, %arg1 : i32, i32
  }
  func.func @transform_2(%arg0: i32, %arg1: i32) -> (i32, i32) {
    %c0_i32 = arith.constant 0 : i32
    return %arg0, %arg1 : i32, i32
  }
}

</mosaic_0001>

<bundles_post_ra>
// kernel: tpu_custom_call.1
= control target key start
LH: loop header
LB: loop body
LE: loop exit
PB: predicated region body
PF: predicated region fallthrough
CT: control target
= control target key end

     0   :  { %7 = vsyncpa [#allocation3], 0  ;;  %s157_s0 = inlined_call_operand.hbm [shape: f32[2,256], index: 0, kind: input, shape index: {}]   ;;  %s158_s1 = inlined_call_operand.vmem [shape: f32[1,256], index: 1, kind: input, shape index: {}]   ;;  %s159_s2 = inlined_call_operand.hbm [shape: f32[2,256], index: 2, kind: output, shape index: {}]  }
   0x1   :  { %8 = vsyncpa [#allocation4], 0  ;;  %s112_s9 = smov [#allocation2]   ;;  %s64_s13 = scalar_lea.hbm %s157_s0, 64 }
   0x2   :  { %s15_s10 = sshll.u32 %s112_s9, 4  ;;  %p65_p0 = scmp.ne.s32.totalorder %s157_s0, %s64_s13  ;;  %s16_s10 = int_to_ptr.vmem [resolvable:$true] %s15_s10 }
   0x3   :  { %p68_p1 = scmp.lt.u32.totalorder %s64_s13, %s157_s0 }
   0x5   :  { %p70_p2 = pnand %p68_p1, %p65_p0 }
   0x7   :  { %73 = shalt.err (!%p70_p2)
}
   0x8   :  { %s74_s18 = scalar_lea.vmem %s16_s10, 64  ;;  %p79_p4 = scmp.lt.s32.totalorder %s16_s10, %s16_s10 }
   0x9   :  { %p75_p3 = scmp.ne.s32.totalorder %s16_s10, %s74_s18  ;;  %p80_p5 = scmp.lt.s32.totalorder %s74_s18, %s74_s18 }
   0xb   :  { %p81_p6 = por %p80_p5, %p79_p4 }
   0xd   :  { %p82_p7 = pnand %p81_p6, %p75_p3 }
   0xf   :  { %85 = shalt.err (!%p82_p7)
}
  0x10   :  { %18 = dma.hbm_to_vmem [thread:$0]  %s157_s0, 64, %s16_s10, [#allocation3]  }
  0x11   :  { %108 = dma.done.wait [#allocation3], 64  }
  0x12   :  { %109 = vsyncadd [#allocation3], 4294967232  ;;  %v27_v0 = vlaneseq  ;;  %v113_v1 = vmov 1983009808   ;;  %v25_v7 = vld [vmem:[%s158_s1] sm:$0x3] }
  0x13   :  { %v37_v2 = vunpack.c.l.s4 %v113_v1  ;;  %v24_v12 = vld [vmem:[#allocation2] sm:$0xf]  ;;  %s114_s23 = smov [#allocation5]  }
  0x14   :  { %v28_v3 = vshrl.u32 %v27_v0, 7  ;;  %s52_s0 = sshll.u32 %s114_s23, 4  ;;  %s53_s0 = int_to_ptr.vmem [resolvable:$true] %s52_s0 }
  0x15   :  { %v38_v6 = vunpack.c.0.s8 %v37_v2  ;;  %s86_s24 = scalar_lea.vmem %s53_s0, 64  ;;  %p91_p9 = scmp.lt.s32.totalorder %s53_s0, %s53_s0 }
  0x16   :  { %v29_v4 = vsub.s32 0, %v28_v3  ;;  %v33_v5 = vsub.s32 1, %v28_v3  ;;  %p87_p8 = scmp.ne.s32.totalorder %s53_s0, %s86_s24  ;;  %p92_p10 = scmp.lt.s32.totalorder %s86_s24, %s86_s24 }
  0x17   :  { %v41_v10 = vsub.s32 %v38_v6, %v28_v3 }
  0x18   :  { %v30_v8 = vrot.slane %v25_v7, %v29_v4  ;;  %v34_v9 = vrot.slane %v25_v7, %v33_v5  ;;  %p93_p11 = por %p92_p10, %p91_p9 }
  0x1a   :  { %v35_v11 = vcombine.low %v30_v8, %v34_v9  ;;  %p94_p12 = pnand %p93_p11, %p87_p8 }
  0x1c   :  { %v42_v13 = vrot.slane %v35_v11, %v41_v10 }
  0x1e   :  { %v44_v14 = vadd.f32 %v42_v13, %v24_v12 }
  0x20   :  { %45 = vst [vmem:[#allocation5] sm:$0xf] %v44_v14 }
  0x21   :  { %97 = shalt.err (!%p94_p12)
}
  0x22   :  { %s98_s26 = scalar_lea.hbm %s159_s2, 64 }
  0x23   :  { %p99_p13 = scmp.ne.s32.totalorder %s159_s2, %s98_s26  ;;  %p102_p0 = scmp.lt.u32.totalorder %s98_s26, %s159_s2 }
  0x25   :  { %p104_p1 = pnand %p102_p0, %p99_p13 }
  0x27   :  { %107 = shalt.err (!%p104_p1)
}
  0x28   :  { %55 = dma.vmem_to_hbm [thread:$0]  %s53_s0, 64, %s159_s2, [#allocation4]  }
  0x29   :  { %110 = dma.done.wait [#allocation4], 64  }
  0x2a   :  { %111 = vsyncadd [#allocation4], 4294967232 }
  0x2b   :  { %59 = vsyncpa [#allocation3], 1 }
  0x2c   :  { %60 = vsyncpa [#allocation4], 1 }

</bundles_post_ra>
